<compile_context>
chip_gen: v6e
topology: v6e:2x2x1
jax: 0.10.0
libtpu: 0.0.40
codegen_flags: <defaults>
</compile_context>

<pallas_src>
import functools

import jax
import jax.numpy as jnp
from jax import lax
from jax.experimental import pallas as pl
from jax.experimental.pallas import tpu as pltpu

_LANE = 128          # pad every feature dim to the 128-lane vreg width
_BIG_TILE_M = 512    # output-row tile of the aggregation matmul (large graphs)
_BIG_TILE_K = 256    # reduction (neighbor) tile of the aggregation matmul


def _round_up(x, m):
    return (x + m - 1) // m * m


def _choose_tiles(n):
    """Return (n_pad, tile_m, tile_k) with n_pad % tile_m == n_pad % tile_k == 0."""
    n128 = _round_up(max(n, 1), _LANE)
    if n128 <= _BIG_TILE_M:
        # Whole graph fits in one row tile: no K loop, minimal padding.
        return n128, n128, n128
    n_pad = _round_up(n, _BIG_TILE_M)
    return n_pad, _BIG_TILE_M, _BIG_TILE_K


# ----------------------------------------------------------------------------
# Pallas kernels
# ----------------------------------------------------------------------------
def _feature_transform_kernel(x_ref, w_ref, o_ref):
    """XW = X @ W for one row tile (computed once per layer, hoisted out of the
    per-row-tile aggregation grid)."""
    o_ref[...] = jnp.dot(
        x_ref[...], w_ref[...], preferred_element_type=jnp.float32
    ).astype(o_ref.dtype)


def _aggregate_kernel(a_ref, xw_ref, b_ref, *refs,
                      apply_relu, fuse_log_softmax, valid_cout):
    """OUT[i-tile] = A_hat[i-tile, :] @ XW, K-tiled with an f32 accumulator.

    a_ref  : (TM, TK)   bf16 tile of the normalized adjacency
    xw_ref : (TK, Cpad) bf16 tile of pre-transformed features
    b_ref  : (1, Cpad)  f32 bias
    outputs: o_ref (TM, Cpad) [+ lp_ref (TM, Cpad) log-softmax when fused]
    scratch: acc_ref (TM, Cpad) f32 accumulator
    """
    if fuse_log_softmax:
        o_ref, lp_ref, acc_ref = refs
    else:
        o_ref, acc_ref = refs

    k = pl.program_id(1)

    @pl.when(k == 0)
    def _():
        acc_ref[...] = jnp.zeros_like(acc_ref)

    acc_ref[...] += jnp.dot(
        a_ref[...], xw_ref[...], preferred_element_type=jnp.float32
    )

    @pl.when(k == pl.num_programs(1) - 1)
    def _():
        out = acc_ref[...] + b_ref[...]          # bias only in finalize
        if apply_relu:
            out = jnp.maximum(out, 0.0)
        o_ref[...] = out.astype(o_ref.dtype)
        if fuse_log_softmax:
            if valid_cout == out.shape[-1]:
                masked = out
            else:
                # Mask padded lanes so they don't perturb the row max / logsumexp.
                lane = lax.broadcasted_iota(jnp.int32, out.shape, 1)
                masked = jnp.where(lane < valid_cout, out, -jnp.inf)
            m = jnp.max(masked, axis=-1, keepdims=True)
            z = masked - m
            lse = jnp.log(jnp.sum(jnp.exp(z), axis=-1, keepdims=True))
            lp_ref[...] = (z - lse).astype(lp_ref.dtype)


# ----------------------------------------------------------------------------
# Pallas wrappers
# ----------------------------------------------------------------------------
def feature_transform(x, w, *, tile_m):
    """(Np, Cin_pad) @ (Cin_pad, Cout_pad) -> (Np, Cout_pad), bf16 out."""
    n_pad, cin = x.shape
    cpad = w.shape[1]
    return pl.pallas_call(
        _feature_transform_kernel,
        out_shape=jax.ShapeDtypeStruct((n_pad, cpad), jnp.bfloat16),
        grid_spec=pl.GridSpec(
            grid=(n_pad // tile_m,),
            in_specs=[
                pl.BlockSpec((tile_m, cin), lambda i: (i, 0)),
                pl.BlockSpec((cin, cpad), lambda i: (0, 0)),   # W resident
            ],
            out_specs=pl.BlockSpec((tile_m, cpad), lambda i: (i, 0)),
        ),
        compiler_params=pltpu.CompilerParams(dimension_semantics=("parallel",)),
    )(x, w)


def aggregate(a_hat, xw, b, *, apply_relu, fuse_log_softmax, valid_cout,
              out_dtype, tile_m, tile_k):
    """A_hat @ XW + b (+ ReLU, + fused log_softmax on the last layer)."""
    n_pad = a_hat.shape[0]
    cpad = xw.shape[1]
    b2 = b.reshape(1, cpad)
    kernel = functools.partial(
        _aggregate_kernel,
        apply_relu=apply_relu,
        fuse_log_softmax=fuse_log_softmax,
        valid_cout=valid_cout,
    )
    if fuse_log_softmax:
        out_shape = (jax.ShapeDtypeStruct((n_pad, cpad), out_dtype),
                     jax.ShapeDtypeStruct((n_pad, cpad), out_dtype))
        out_specs = (pl.BlockSpec((tile_m, cpad), lambda i, k: (i, 0)),
                     pl.BlockSpec((tile_m, cpad), lambda i, k: (i, 0)))
    else:
        out_shape = jax.ShapeDtypeStruct((n_pad, cpad), out_dtype)
        out_specs = pl.BlockSpec((tile_m, cpad), lambda i, k: (i, 0))

    return pl.pallas_call(
        kernel,
        out_shape=out_shape,
        grid_spec=pltpu.PrefetchScalarGridSpec(
            num_scalar_prefetch=0,
            grid=(n_pad // tile_m, n_pad // tile_k),
            in_specs=[
                pl.BlockSpec((tile_m, tile_k), lambda i, k: (i, k)),  # A_hat
                pl.BlockSpec((tile_k, cpad), lambda i, k: (k, 0)),    # XW
                pl.BlockSpec((1, cpad), lambda i, k: (0, 0)),         # bias
            ],
            out_specs=out_specs,
            scratch_shapes=[pltpu.VMEM((tile_m, cpad), jnp.float32)],
        ),
        compiler_params=pltpu.CompilerParams(
            dimension_semantics=("parallel", "arbitrary"),
        ),
    )(a_hat, xw, b2)


# ----------------------------------------------------------------------------
# Glue: graph normalization + deterministic parameter init (plain JAX)
# ----------------------------------------------------------------------------
def build_gcn_norm_adj(edge_index, num_nodes):
    """A_hat = D^{-1/2}(A + I)D^{-1/2}, A[dst, src] = 1 (source_to_target).
    Duplicate edges accumulate weight > 1, matching PyG's default (no coalescing)."""
    src, dst = edge_index[0], edge_index[1]
    a = jnp.zeros((num_nodes, num_nodes), jnp.float32)
    a = a.at[dst, src].add(1.0)
    a = a + jnp.eye(num_nodes, dtype=jnp.float32)
    deg = jnp.sum(a, axis=1)
    dinv = jnp.where(deg > 0, 1.0 / jnp.sqrt(deg), 0.0)
    return dinv[:, None] * a * dinv[None, :]


def init_gcn_params(key, in_channels, hidden_channels, out_channels, num_layers):
    """Glorot-uniform weights, zero biases (matches PyG GCNConv/Linear defaults)."""
    dims = [in_channels] + [hidden_channels] * (num_layers - 1) + [out_channels]
    params = []
    keys = jax.random.split(key, num_layers)
    for l in range(num_layers):
        fan_in, fan_out = dims[l], dims[l + 1]
        limit = (6.0 / (fan_in + fan_out)) ** 0.5
        w = jax.random.uniform(keys[l], (fan_in, fan_out), jnp.float32,
                               minval=-limit, maxval=limit)
        b = jnp.zeros((fan_out,), jnp.float32)
        params.append((w, b))
    return params


def gcn_forward(x, edge_index, params):
    n, cin = x.shape
    num_layers = len(params)

    # Adaptive padding/tiling of the node axis; padded rows/cols of A_hat are 0.
    n_pad, tile_m, tile_k = _choose_tiles(n)
    a_hat = build_gcn_norm_adj(edge_index, n)
    a_hat = (jnp.zeros((n_pad, n_pad), jnp.float32)
             .at[:n, :n].set(a_hat).astype(jnp.bfloat16))

    # Pad feature dims to lane-dense widths; zero-padded columns stay zero
    # through every layer (padded W rows/cols and bias entries are zero).
    cin_pad = _round_up(cin, _LANE)
    h = (jnp.zeros((n_pad, cin_pad), jnp.float32)
         .at[:n, :cin].set(x).astype(jnp.bfloat16))

    for l, (w, b) in enumerate(params):
        is_last = l == num_layers - 1
        din, dout = w.shape
        din_pad = _round_up(din, _LANE)
        dout_pad = _round_up(dout, _LANE)
        w_pad = (jnp.zeros((din_pad, dout_pad), jnp.float32)
                 .at[:din, :dout].set(w).astype(jnp.bfloat16))
        b_pad = jnp.zeros((dout_pad,), jnp.float32).at[:dout].set(b)

        xw = feature_transform(h, w_pad, tile_m=tile_m)   # once per layer
        if is_last:
            logits, log_probs = aggregate(
                a_hat, xw, b_pad, apply_relu=False, fuse_log_softmax=True,
                valid_cout=dout, out_dtype=jnp.float32,
                tile_m=tile_m, tile_k=tile_k)
            return logits[:n, :dout], log_probs[:n, :dout]
        h = aggregate(
            a_hat, xw, b_pad, apply_relu=True, fuse_log_softmax=False,
            valid_cout=dout, out_dtype=jnp.bfloat16,
            tile_m=tile_m, tile_k=tile_k)
        # dropout would go here during training (eval: identity)


# ----------------------------------------------------------------------------
# Main
# ----------------------------------------------------------------------------
if __name__ == "__main__":
    key = jax.random.PRNGKey(0)
    kx, ksrc, kdst, kp = jax.random.split(key, 4)

    num_nodes = 16
    num_edges = 40
    in_channels = 8
    hidden_channels = 32
    out_channels = 4
    num_layers = 3
    dropout = 0.5  # unused in eval-mode forward

    x = jax.random.normal(kx, (num_nodes, in_channels), jnp.float32)
    src = jax.random.randint(ksrc, (num_edges,), 0, num_nodes)
    dst = jax.random.randint(kdst, (num_edges,), 0, num_nodes)
    edge_index = jnp.stack([src, dst], axis=0)  # (2, E)

    params = init_gcn_params(kp, in_channels, hidden_channels, out_channels,
                             num_layers)

    out, log_probs = gcn_forward(x, edge_index, params)
    jax.block_until_ready((out, log_probs))

    assert out.shape == (num_nodes, out_channels)
    assert log_probs.shape == (num_nodes, out_channels)
    assert bool(jnp.all(jnp.isfinite(out)))
    assert bool(jnp.all(jnp.isfinite(log_probs)))
    # log_softmax rows must exponentiate-sum to 1.
    assert bool(jnp.allclose(jnp.sum(jnp.exp(log_probs), axis=-1), 1.0, atol=1e-3))
    print("KERNEL_OK")
</pallas_src>

<mosaic_0001>
module attributes {stable_mosaic.version = 11 : i64} {
  func.func @_feature_transform_kernel(%arg0: i32, %arg1: memref<128x128xbf16, #tpu.memory_space<vmem>>, %arg2: memref<128x128xbf16, #tpu.memory_space<vmem>>, %arg3: memref<128x128xbf16, #tpu.memory_space<vmem>>) attributes {dimension_semantics = [#tpu.dimension_semantics<parallel>], iteration_bounds = array<i64: 1>, scalar_prefetch = 0 : i64, scratch_operands = 0 : i64, tpu.core_type = #tpu.core_type<tc>, window_params = [{transform_indices = @transform_0, window_bounds = array<i64: 128, 128>}, {pipeline_mode = #tpu.pipeline_mode<synchronous>, transform_indices = @transform_1, window_bounds = array<i64: 128, 128>}, {transform_indices = @transform_2, window_bounds = array<i64: 128, 128>}]} {
    %c0 = arith.constant 0 : index
    %c0_0 = arith.constant 0 : index
    %0 = vector.load %arg1[%c0, %c0_0] : memref<128x128xbf16, #tpu.memory_space<vmem>>, vector<128x128xbf16>
    %c0_1 = arith.constant 0 : index
    %c0_2 = arith.constant 0 : index
    %1 = vector.load %arg2[%c0_1, %c0_2] : memref<128x128xbf16, #tpu.memory_space<vmem>>, vector<128x128xbf16>
    %cst = arith.constant dense<0.000000e+00> : vector<128x128xf32>
    %2 = tpu.matmul %0, %1, %cst {dimension_numbers = #tpu.dot_dimension_numbers<[1], [0], [0], [1], [0, 0, 1, 1], [], []>} : vector<128x128xbf16>, vector<128x128xbf16>, vector<128x128xf32> -> vector<128x128xf32>
    %3 = arith.truncf %2 : vector<128x128xf32> to vector<128x128xbf16>
    %c0_3 = arith.constant 0 : index
    %c0_4 = arith.constant 0 : index
    %4 = vector.load %arg3[%c0_3, %c0_4] : memref<128x128xbf16, #tpu.memory_space<vmem>>, vector<128x128xbf16>
    tpu.vector_store %arg3[%c0_3, %c0_4], %3 {strides = array<i32>} : memref<128x128xbf16, #tpu.memory_space<vmem>>, vector<128x128xbf16>,
    return
  }
  func.func @transform_0(%arg0: i32) -> (i32, i32) {
    %c0_i32 = arith.constant 0 : i32
    %c0_i32_0 = arith.constant 0 : i32
    return %arg0, %c0_i32 : i32, i32
  }
  func.func @transform_1(%arg0: i32) -> (i32, i32) {
    %c0_i32 = arith.constant 0 : i32
    %c0_i32_0 = arith.constant 0 : i32
    %c0_i32_1 = arith.constant 0 : i32
    return %c0_i32, %c0_i32_0 : i32, i32
  }
  func.func @transform_2(%arg0: i32) -> (i32, i32) {
    %c0_i32 = arith.constant 0 : i32
    %c0_i32_0 = arith.constant 0 : i32
    return %arg0, %c0_i32 : i32, i32
  }
}

</mosaic_0001>

<bundles_post_ra>
// kernel: tpu_custom_call.1
= control target key start
LH: loop header
LB: loop body
LE: loop exit
PB: predicated region body
PF: predicated region fallthrough
CT: control target
= control target key end

     0   :  { %7 = vsyncpa [#allocation3], 0  ;;  %s648_s0 = inlined_call_operand.hbm [shape: bf16[128,128], index: 0, kind: input, shape index: {}]   ;;  %s649_s1 = inlined_call_operand.hbm [shape: bf16[128,128], index: 1, kind: input, shape index: {}]   ;;  %s650_s2 = inlined_call_operand.hbm [shape: bf16[128,128], index: 2, kind: output, shape index: {}]  }
   0x1   :  { %8 = vsyncpa [#allocation6], 0 }
   0x2   :  { %9 = vsyncpa [#allocation4], 0  ;;  %s610_s9 = smov [#allocation2]  }
   0x3   :  { %s15_s10 = sshll.u32 %s610_s9, 4  ;;  %s16_s10 = int_to_ptr.vmem [resolvable:$true] %s15_s10 }
   0x4   :  { %s552_s11 = scalar_lea.vmem %s16_s10, 1024  ;;  %p557_p1 = scmp.lt.s32.totalorder %s16_s10, %s16_s10 }
   0x5   :  { %p553_p0 = scmp.ne.s32.totalorder %s16_s10, %s552_s11  ;;  %p558_p2 = scmp.lt.s32.totalorder %s552_s11, %s552_s11 }
   0x7   :  { %p559_p3 = por %p558_p2, %p557_p1 }
   0x9   :  { %p560_p4 = pnand %p559_p3, %p553_p0 }
   0xb   :  { %563 = shalt.err (!%p560_p4)
}
   0xc   :  { %s611_s12 = smov 64   ;;  %s612_s13 = smov 4  }
   0xd   :  { %21 = dma.hbm_to_vmem [thread:$0]  %s648_s0, 1024, %s16_s10, [#allocation3], %s611_s12, %s611_s12, %s612_s13  }
   0xe   :  { %s613_s16 = smov [#allocation5]  }
   0xf   :  { %s27_s17 = sshll.u32 %s613_s16, 4  ;;  %s28_s17 = int_to_ptr.vmem [resolvable:$true] %s27_s17 }
  0x10   :  { %s572_s18 = scalar_lea.vmem %s28_s17, 1024  ;;  %p577_p6 = scmp.lt.s32.totalorder %s28_s17, %s28_s17 }
  0x11   :  { %p573_p5 = scmp.ne.s32.totalorder %s28_s17, %s572_s18  ;;  %p578_p7 = scmp.lt.s32.totalorder %s572_s18, %s572_s18 }
  0x13   :  { %p579_p8 = por %p578_p7, %p577_p6 }
  0x15   :  { %p580_p9 = pnand %p579_p8, %p573_p5 }
  0x17   :  { %583 = shalt.err (!%p580_p9)
}
  0x18   :  { %33 = dma.hbm_to_vmem [thread:$0]  %s649_s1, 1024, %s28_s17, [#allocation6], %s611_s12, %s611_s12, %s612_s13  }
  0x19   :  { %604 = dma.done.wait [#allocation3], 1024  }
  0x1a   :  { %605 = vsyncadd [#allocation3], 4294966272 }
  0x1b   :  { %606 = dma.done.wait [#allocation6], 1024  }
  0x1c   :  { %607 = vsyncadd [#allocation6], 4294966272  ;;  %v528_v0 = vld [vmem:[#allocation5 + $0x38] sm:$0xff]   ;;  %v529_v1 = vld [vmem:[#allocation5 + $0x30] sm:$0xff]   ;;  %s614_s0 = smov [#allocation7]  }
  0x1d   :  { %475 = vmatprep.subr.bf16.mxu0 %v528_v0  ;;  %507 = vmatprep.subr.bf16.mxu1 %v528_v0  ;;  %v530_v2 = vld [vmem:[#allocation5 + $0x28] sm:$0xff]   ;;  %v531_v3 = vld [vmem:[#allocation5 + $0x20] sm:$0xff]   ;;  %v532_v6 = vld [vmem:[#allocation5 + $0x18] sm:$0xff]   ;;  %s351_s1 = sshll.u32 %s614_s0, 4  ;;  %s352_s1 = int_to_ptr.vmem [resolvable:$true] %s351_s1 }
  0x1e   :  { %476 = vmatpush3.bf16.msra.mxu0 %v528_v0  ;;  %515 = vmatpush3.bf16.msra.mxu1 %v528_v0  ;;  %v536_v4 = vld [vmem:[#allocation2] sm:$0xff]   ;;  %v533_v7 = vld [vmem:[#allocation5 + $0x10] sm:$0xff]   ;;  %v534_v8 = vld [vmem:[#allocation5 + $0x8] sm:$0xff]   ;;  %s584_s21 = scalar_lea.vmem %s352_s1, 1024  ;;  %p589_p11 = scmp.lt.s32.totalorder %s352_s1, %s352_s1 }
  0x1f   :  { %477 = vmatprep.subr.bf16.mxu0 %v529_v1  ;;  %508 = vmatprep.subr.bf16.mxu1 %v529_v1  ;;  %v537_v5 = vld [vmem:[#allocation2 + $0x20] sm:$0xff]   ;;  %v538_v10 = vld [vmem:[#allocation2 + $0x8] sm:$0xff]   ;;  %v540_v12 = vld [vmem:[#allocation2 + $0x10] sm:$0xff]   ;;  %p585_p10 = scmp.ne.s32.totalorder %s352_s1, %s584_s21  ;;  %p590_p12 = scmp.lt.s32.totalorder %s584_s21, %s584_s21 }
  0x20   :  { %491 = vmatprep.mubr.bf16.mxu0 %v536_v4  ;;  %499 = vmatprep.mubr.bf16.mxu1 %v537_v5  ;;  %v535_v9 = vld [vmem:[#allocation5] sm:$0xff]   ;;  %v539_v11 = vld [vmem:[#allocation2 + $0x28] sm:$0xff]   ;;  %v541_v13 = vld [vmem:[#allocation2 + $0x30] sm:$0xff]  }
  0x21   :  { %v542_v14 = vld [vmem:[#allocation2 + $0x18] sm:$0xff]   ;;  %p591_p13 = por %p590_p12, %p589_p11 }
  0x22   :  { %478 = vmatpush3.bf16.msra.mxu0 %v529_v1  ;;  %516 = vmatpush3.bf16.msra.mxu1 %v529_v1  ;;  %v543_v15 = vld [vmem:[#allocation2 + $0x38] sm:$0xff]  }
  0x23   :  { %479 = vmatprep.subr.bf16.mxu0 %v530_v2  ;;  %509 = vmatprep.subr.bf16.mxu1 %v530_v2  ;;  %p592_p0 = pnand %p591_p13, %p585_p10 }
  0x26   :  { %480 = vmatpush3.bf16.msra.mxu0 %v530_v2  ;;  %517 = vmatpush3.bf16.msra.mxu1 %v530_v2 }
  0x27   :  { %481 = vmatprep.subr.bf16.mxu0 %v531_v3  ;;  %510 = vmatprep.subr.bf16.mxu1 %v531_v3 }
  0x2a   :  { %482 = vmatpush3.bf16.msra.mxu0 %v531_v3  ;;  %518 = vmatpush3.bf16.msra.mxu1 %v531_v3 }
  0x2b   :  { %483 = vmatprep.subr.bf16.mxu0 %v532_v6  ;;  %511 = vmatprep.subr.bf16.mxu1 %v532_v6 }
  0x2e   :  { %484 = vmatpush3.bf16.msra.mxu0 %v532_v6  ;;  %519 = vmatpush3.bf16.msra.mxu1 %v532_v6 }
  0x2f   :  { %485 = vmatprep.subr.bf16.mxu0 %v533_v7  ;;  %512 = vmatprep.subr.bf16.mxu1 %v533_v7 }
  0x32   :  { %486 = vmatpush3.bf16.msra.mxu0 %v533_v7  ;;  %520 = vmatpush3.bf16.msra.mxu1 %v533_v7 }
  0x33   :  { %487 = vmatprep.subr.bf16.mxu0 %v534_v8  ;;  %513 = vmatprep.subr.bf16.mxu1 %v534_v8 }
  0x36   :  { %488 = vmatpush3.bf16.msra.mxu0 %v534_v8  ;;  %521 = vmatpush3.bf16.msra.mxu1 %v534_v8 }
  0x37   :  { %489 = vmatprep.subr.bf16.mxu0 %v535_v9  ;;  %514 = vmatprep.subr.bf16.mxu1 %v535_v9 }
  0x3a   :  { %490 = vmatpush3.bf16.msra.mxu0 %v535_v9  ;;  %522 = vmatpush3.bf16.msra.mxu1 %v535_v9 }
  0x3d   :  { %492 = vmatmul.mubr.bf16.vlgmr.msra.gmra.mxu0 %v538_v10  ;;  %500 = vmatmul.mubr.bf16.vlgmr.msra.gmra.mxu1 %v539_v11 }
  0x3e   :  { %495 = vmatprep.mubr.bf16.mxu0 %v540_v12  ;;  %503 = vmatprep.mubr.bf16.mxu1 %v541_v13 }
  0x45   :  { %496 = vmatmul.mubr.bf16.gmra.mxu0 %v542_v14  ;;  %504 = vmatmul.mubr.bf16.gmra.mxu1 %v543_v15 }
  0xfd   :  { %v493_v16 = vpop.f32.mrf.mxu0  ;;  %v501_v17 = vpop.f32.mrf.mxu1 }
  0xff   :  { %v203_v18 = vpop.f32.mrf.mxu0  ;;  %v235_v19 = vpop.f32.mrf.mxu1 }
 0x101   :  { %v494_v20 = vpop.f32.mrf.mxu0  ;;  %v502_v21 = vpop.f32.mrf.mxu1 }
 0x102   :  { %v420_v22 = vpack.c.bf16 %v494_v20, %v493_v16  ;;  %v440_v23 = vpack.c.bf16 %v502_v21, %v501_v17 }
 0x103   :  { %v206_v24 = vpop.f32.mrf.mxu0  ;;  %v238_v25 = vpop.f32.mrf.mxu1 }
 0x104   :  { %452 = vst [vmem:[#allocation7 + $0x8] sm:$0xff] %v420_v22   ;;  %456 = vst [vmem:[#allocation7 + $0x28] sm:$0xff] %v440_v23   ;;  %v415_v26 = vpack.c.bf16 %v206_v24, %v203_v18  ;;  %v435_v27 = vpack.c.bf16 %v238_v25, %v235_v19 }
 0x105   :  { %v497_v28 = vpop.f32.mrf.mxu0  ;;  %v505_v29 = vpop.f32.mrf.mxu1 }
 0x106   :  { %416 = vst [vmem:[#allocation7] sm:$0xff] %v415_v26   ;;  %455 = vst [vmem:[#allocation7 + $0x20] sm:$0xff] %v435_v27  }
 0x107   :  { %v219_v30 = vpop.f32.mrf.mxu0  ;;  %v251_v31 = vpop.f32.mrf.mxu1 }
 0x109   :  { %v498_v32 = vpop.f32.mrf.mxu0  ;;  %v506_v33 = vpop.f32.mrf.mxu1 }
 0x10a   :  { %v430_v34 = vpack.c.bf16 %v498_v32, %v497_v28  ;;  %v450_v35 = vpack.c.bf16 %v506_v33, %v505_v29 }
 0x10b   :  { %v222_v36 = vpop.f32.mrf.mxu0  ;;  %v254_v37 = vpop.f32.mrf.mxu1 }
 0x10c   :  { %454 = vst [vmem:[#allocation7 + $0x18] sm:$0xff] %v430_v34   ;;  %458 = vst [vmem:[#allocation7 + $0x38] sm:$0xff] %v450_v35   ;;  %v425_v38 = vpack.c.bf16 %v222_v36, %v219_v30  ;;  %v445_v39 = vpack.c.bf16 %v254_v37, %v251_v31 }
 0x10e   :  { %453 = vst [vmem:[#allocation7 + $0x10] sm:$0xff] %v425_v38   ;;  %457 = vst [vmem:[#allocation7 + $0x30] sm:$0xff] %v445_v39  }
 0x10f   :  { %595 = shalt.err (!%p592_p0)
}
 0x110   :  { %357 = dma.vmem_to_hbm [thread:$0]  %s352_s1, 1024, %s650_s2, [#allocation4], %s611_s12, %s611_s12, %s612_s13  }
 0x111   :  { %608 = dma.done.wait [#allocation4], 1024  }
 0x112   :  { %609 = vsyncadd [#allocation4], 4294966272 }
 0x113   :  { %361 = vsyncpa [#allocation3], 1 }
 0x114   :  { %362 = vsyncpa [#allocation6], 1 }
 0x115   :  { %363 = vsyncpa [#allocation4], 1 }

</bundles_post_ra>
